<compile_context>
chip_gen: v6e
topology: v6e:2x2x1
jax: 0.10.0
libtpu: 0.0.40
codegen_flags: <defaults>
</compile_context>

<pallas_src>
import jax
import jax.numpy as jnp
from jax.experimental import pallas as pl
from jax.experimental.pallas import tpu as pltpu


def _encoder_kernel(x_ref, w_ref, o_ref):
    # x_ref: (9*Cin + 1, 4*N*Ho*Wo)  im2col patches + ones row,
    #        lane order (dh, dw, n, ho, wo)
    # w_ref: (Cout, 9*Cin + 1)       conv taps (kh, kw, ci order) + bias column
    # o_ref: (Cout, N*Ho*Wo)         pooled output, lane order (n, ho, wo)
    nq = o_ref.shape[1]              # N * Ho * Wo  (== 128 in the toy test)

    # Single MXU push, f32 accumulation (bias already included via ones row).
    conv = jnp.dot(w_ref[...], x_ref[...], preferred_element_type=jnp.float32)

    # MaxPool2d(2, 2): the four (dh, dw) sub-grids are contiguous, lane-aligned
    # nq-wide slabs -> three elementwise VPU maxes, zero data movement.
    pooled = jnp.maximum(
        jnp.maximum(conv[:, 0 * nq:1 * nq], conv[:, 1 * nq:2 * nq]),
        jnp.maximum(conv[:, 2 * nq:3 * nq], conv[:, 3 * nq:4 * nq]))

    # Lane-dense (Cout, N*Ho*Wo) store — unmasked full-width vst.
    o_ref[...] = pooled.astype(o_ref.dtype)


def encoder_forward(x_nchw, weight, bias, use_bf16_operands=False):
    """Conv2d(3x3, stride 1, pad 1) + MaxPool2d(2, 2).

    x_nchw: (N, Cin, H, W); weight: (Cout, Cin, 3, 3); bias: (Cout,).
    Returns (N, Cout, H//2, W//2) in x_nchw.dtype.
    """
    out_dtype = x_nchw.dtype
    N, Cin, H, W = x_nchw.shape
    Cout = weight.shape[0]
    assert H % 2 == 0 and W % 2 == 0, "MaxPool2d(2,2) requires even spatial dims"
    Ho, Wo = H // 2, W // 2
    Q = Ho * Wo
    K = 9 * Cin
    K1 = K + 1                      # + ones row for the folded bias
    L = 4 * N * Q                   # total lane width of the conv push (== N*H*W)

    if use_bf16_operands:
        # Halve HBM/VMEM bytes on the patch stream; MXU still accumulates f32.
        x_nchw = x_nchw.astype(jnp.bfloat16)
        weight = weight.astype(jnp.bfloat16)
        bias = bias.astype(jnp.bfloat16)
    op_dtype = x_nchw.dtype

    # ---- wrapper-side layout plumbing (zero FLOPs) ---------------------------
    xp = jnp.pad(x_nchw, ((0, 0), (0, 0), (1, 1), (1, 1)))          # (N,Cin,H+2,W+2)
    # im2col: 9 shifted slices stacked on the contraction axis (k = (kh,kw,ci)).
    taps = [xp[:, :, kh:kh + H, kw:kw + W]
            for kh in range(3) for kw in range(3)]                   # each (N,Cin,H,W)
    cols = jnp.concatenate(taps, axis=1)                             # (N, K, H, W)
    # Lane order (dh, dw, n, ho, wo): pool sub-grids become contiguous,
    # 128-lane-aligned slabs and the batch is folded into the lane axis.
    cols = cols.reshape(N, K, Ho, 2, Wo, 2)                          # (n,k,ho,dh,wo,dw)
    cols = jnp.transpose(cols, (1, 3, 5, 0, 2, 4))                   # (k,dh,dw,n,ho,wo)
    cols = cols.reshape(K, L)
    # Fold the bias into the matmul: ones row + bias column.
    cols_aug = jnp.concatenate([cols, jnp.ones((1, L), dtype=op_dtype)], axis=0)

    # (Cout, Cin, 3, 3) -> (Cout, 3, 3, Cin) -> (Cout, K); matches cols' k order.
    w2 = jnp.transpose(weight, (0, 2, 3, 1)).reshape(Cout, K)
    w_aug = jnp.concatenate([w2, bias.reshape(Cout, 1)], axis=1)     # (Cout, K+1)

    itemsize = jnp.dtype(op_dtype).itemsize
    cost = pl.CostEstimate(
        flops=2 * Cout * K1 * L + 3 * Cout * N * Q,
        transcendentals=0,
        bytes_accessed=(K1 * L + Cout * K1) * itemsize
        + Cout * N * Q * jnp.dtype(out_dtype).itemsize)

    out2d = pl.pallas_call(
        _encoder_kernel,
        out_shape=jax.ShapeDtypeStruct((Cout, N * Q), out_dtype),
        grid=(1,),                                   # single step: one wide MXU push
        in_specs=[
            pl.BlockSpec((K1, L), lambda i: (0, 0)),
            pl.BlockSpec((Cout, K1), lambda i: (0, 0)),
        ],
        out_specs=pl.BlockSpec((Cout, N * Q), lambda i: (0, 0)),
        compiler_params=pltpu.CompilerParams(dimension_semantics=("arbitrary",)),
        cost_estimate=cost,
    )(cols_aug, w_aug)

    # (Cout, N, Ho, Wo) -> NCHW: tiny (4 KB) wrapper transpose.
    return jnp.transpose(out2d.reshape(Cout, N, Ho, Wo), (1, 0, 2, 3))


def _reference_forward(x_nchw, weight, bias):
    # Pure-JAX reference: conv2d (stride 1, pad 1) + maxpool 2x2.
    y = jax.lax.conv_general_dilated(
        x_nchw, weight, window_strides=(1, 1), padding=((1, 1), (1, 1)),
        dimension_numbers=("NCHW", "OIHW", "NCHW"))
    y = y + bias[None, :, None, None]
    return jax.lax.reduce_window(
        y, -jnp.inf, jax.lax.max,
        window_dimensions=(1, 1, 2, 2), window_strides=(1, 1, 2, 2),
        padding="VALID")


if __name__ == "__main__":
    key = jax.random.PRNGKey(0)
    kx, kw, kb = jax.random.split(key, 3)

    N, Cin, Cout, H, W = 2, 4, 8, 16, 16
    x = jax.random.normal(kx, (N, Cin, H, W), dtype=jnp.float32)
    # Deterministic synthetic parameters (Conv2d(in=4, out=8, k=3) shapes).
    fan_in = Cin * 3 * 3
    weight = jax.random.normal(kw, (Cout, Cin, 3, 3), dtype=jnp.float32) / jnp.sqrt(fan_in)
    bias = jax.random.normal(kb, (Cout,), dtype=jnp.float32) * 0.1

    fwd = jax.jit(encoder_forward, static_argnames=("use_bf16_operands",))

    # f32 path (reference-tight tolerance).
    out = jax.block_until_ready(fwd(x, weight, bias))
    ref = jax.block_until_ready(_reference_forward(x, weight, bias))
    assert out.shape == (N, Cout, H // 2, W // 2), out.shape
    assert jnp.allclose(out, ref, atol=1e-4, rtol=1e-4), float(jnp.max(jnp.abs(out - ref)))

    # bf16-operand path (memory-bound headroom; looser tolerance by design).
    out_bf16 = jax.block_until_ready(fwd(x, weight, bias, use_bf16_operands=True))
    assert out_bf16.shape == (N, Cout, H // 2, W // 2), out_bf16.shape
    assert jnp.allclose(out_bf16, ref, atol=5e-2, rtol=5e-2), \
        float(jnp.max(jnp.abs(out_bf16 - ref)))

    print("KERNEL_OK")
</pallas_src>

<mosaic_0001>
module attributes {stable_mosaic.version = 11 : i64} {
  func.func @_encoder_kernel(%arg0: i32, %arg1: memref<37x512xf32, #tpu.memory_space<vmem>>, %arg2: memref<8x37xf32, #tpu.memory_space<vmem>>, %arg3: memref<8x128xf32, #tpu.memory_space<vmem>>) attributes {dimension_semantics = [#tpu.dimension_semantics<arbitrary>], iteration_bounds = array<i64: 1>, scalar_prefetch = 0 : i64, scratch_operands = 0 : i64, tpu.core_type = #tpu.core_type<tc>, window_params = [{pipeline_mode = #tpu.pipeline_mode<synchronous>, transform_indices = @transform_0, window_bounds = array<i64: 37, 512>}, {pipeline_mode = #tpu.pipeline_mode<synchronous>, transform_indices = @transform_1, window_bounds = array<i64: 8, 37>}, {pipeline_mode = #tpu.pipeline_mode<synchronous>, transform_indices = @transform_2, window_bounds = array<i64: 8, 128>}]} {
    %c0 = arith.constant 0 : index
    %c0_0 = arith.constant 0 : index
    %0 = vector.load %arg2[%c0, %c0_0] : memref<8x37xf32, #tpu.memory_space<vmem>>, vector<8x37xf32>
    %c0_1 = arith.constant 0 : index
    %c0_2 = arith.constant 0 : index
    %1 = vector.load %arg1[%c0_1, %c0_2] : memref<37x512xf32, #tpu.memory_space<vmem>>, vector<37x512xf32>
    %cst = arith.constant dense<0.000000e+00> : vector<8x512xf32>
    %2 = tpu.matmul %0, %1, %cst {dimension_numbers = #tpu.dot_dimension_numbers<[1], [0], [0], [1], [0, 0, 1, 1], [], []>} : vector<8x37xf32>, vector<37x512xf32>, vector<8x512xf32> -> vector<8x512xf32>
    %3 = vector.extract_strided_slice %2 {offsets = [0, 0], sizes = [8, 128], strides = [1, 1]} : vector<8x512xf32> to vector<8x128xf32>
    %4 = vector.extract_strided_slice %2 {offsets = [0, 128], sizes = [8, 128], strides = [1, 1]} : vector<8x512xf32> to vector<8x128xf32>
    %5 = arith.maximumf %3, %4 : vector<8x128xf32>
    %6 = vector.extract_strided_slice %2 {offsets = [0, 256], sizes = [8, 128], strides = [1, 1]} : vector<8x512xf32> to vector<8x128xf32>
    %7 = vector.extract_strided_slice %2 {offsets = [0, 384], sizes = [8, 128], strides = [1, 1]} : vector<8x512xf32> to vector<8x128xf32>
    %8 = arith.maximumf %6, %7 : vector<8x128xf32>
    %9 = arith.maximumf %5, %8 : vector<8x128xf32>
    %c0_3 = arith.constant 0 : index
    %c0_4 = arith.constant 0 : index
    %10 = vector.load %arg3[%c0_3, %c0_4] : memref<8x128xf32, #tpu.memory_space<vmem>>, vector<8x128xf32>
    tpu.vector_store %arg3[%c0_3, %c0_4], %9 {strides = array<i32>} : memref<8x128xf32, #tpu.memory_space<vmem>>, vector<8x128xf32>,
    return
  }
  func.func @transform_0(%arg0: i32) -> (i32, i32) {
    %c0_i32 = arith.constant 0 : i32
    %c0_i32_0 = arith.constant 0 : i32
    %c0_i32_1 = arith.constant 0 : i32
    return %c0_i32, %c0_i32_0 : i32, i32
  }
  func.func @transform_1(%arg0: i32) -> (i32, i32) {
    %c0_i32 = arith.constant 0 : i32
    %c0_i32_0 = arith.constant 0 : i32
    %c0_i32_1 = arith.constant 0 : i32
    return %c0_i32, %c0_i32_0 : i32, i32
  }
  func.func @transform_2(%arg0: i32) -> (i32, i32) {
    %c0_i32 = arith.constant 0 : i32
    %c0_i32_0 = arith.constant 0 : i32
    %c0_i32_1 = arith.constant 0 : i32
    return %c0_i32, %c0_i32_0 : i32, i32
  }
}

</mosaic_0001>

<bundles_post_ra>
// kernel: encoder_forward.1
= control target key start
LH: loop header
LB: loop body
LE: loop exit
PB: predicated region body
PF: predicated region fallthrough
CT: control target
= control target key end

     0   :  { %vm36_vm0 = vcmask 1044480   ;;  %v206_v3 = vmov 0.0   ;;  %vm32_vm1 = vcmask 302080   ;;  %s288_s0 = inlined_call_operand.vmem [shape: f32[37,512], index: 0, kind: input, shape index: {}]   ;;  %s289_s1 = inlined_call_operand.vmem [shape: f32[8,37], index: 1, kind: input, shape index: {}]   ;;  %s290_s2 = inlined_call_operand.vmem [shape: f32[8,128], index: 2, kind: output, shape index: {}]  }
   0x1   :  { %v29_v0 = vld [vmem:[%s288_s0 + $0x88] sm:$0x1f]  ;;  %v31_v1 = vld [vmem:[%s288_s0 + $0x98] sm:$0x1f]  ;;  %v28_v2 = vld [vmem:[%s288_s0 + $0x80] sm:$0x1f]  ;;  %113 = vmatprep.mubr.f32.mxu0 %v206_v3  ;;  %184 = vmatprep.mubr.f32.mxu1 %v206_v3 }
   0x2   :  { %199 = vmatprep.subr.msk.mxu0 %vm36_vm0, %v29_v0  ;;  %202 = vmatprep.subr.msk.mxu1 %vm36_vm0, %v31_v1  ;;  %v30_v4 = vld [vmem:[%s288_s0 + $0x90] sm:$0x1f]  ;;  %v25_v5 = vld [vmem:[%s288_s0 + $0x68] sm:$0xff]  ;;  %v27_v6 = vld [vmem:[%s288_s0 + $0x78] sm:$0xff] }
   0x3   :  { %200 = vmatpush1.msk.msra.mxu0 %vm36_vm0, %v28_v2  ;;  %203 = vmatpush1.msk.msra.mxu1 %vm36_vm0, %v30_v4  ;;  %v24_v7 = vld [vmem:[%s288_s0 + $0x60] sm:$0xff]  ;;  %v26_v8 = vld [vmem:[%s288_s0 + $0x70] sm:$0xff]  ;;  %v21_v9 = vld [vmem:[%s288_s0 + $0x48] sm:$0xff] }
   0x4   :  { %73 = vmatprep.subr.mxu0 %v25_v5  ;;  %144 = vmatprep.subr.mxu1 %v27_v6  ;;  %v23_v10 = vld [vmem:[%s288_s0 + $0x58] sm:$0xff]  ;;  %v20_v11 = vld [vmem:[%s288_s0 + $0x40] sm:$0xff]  ;;  %v22_v12 = vld [vmem:[%s288_s0 + $0x50] sm:$0xff] }
   0x5   :  { %74 = vmatpush1.msra.mxu0 %v24_v7  ;;  %145 = vmatpush1.msra.mxu1 %v26_v8  ;;  %v17_v13 = vld [vmem:[%s288_s0 + $0x28] sm:$0xff]  ;;  %v19_v14 = vld [vmem:[%s288_s0 + $0x38] sm:$0xff]  ;;  %v16_v15 = vld [vmem:[%s288_s0 + $0x20] sm:$0xff] }
   0x6   :  { %75 = vmatprep.subr.mxu0 %v21_v9  ;;  %146 = vmatprep.subr.mxu1 %v23_v10  ;;  %v18_v16 = vld [vmem:[%s288_s0 + $0x30] sm:$0xff]  ;;  %v13_v17 = vld [vmem:[%s288_s0 + $0x8] sm:$0xff]  ;;  %v15_v18 = vld [vmem:[%s288_s0 + $0x18] sm:$0xff] }
   0x7   :  { %76 = vmatpush1.msra.mxu0 %v20_v11  ;;  %147 = vmatpush1.msra.mxu1 %v22_v12  ;;  %v12_v19 = vld [vmem:[%s288_s0] sm:$0xff]  ;;  %v14_v20 = vld [vmem:[%s288_s0 + $0x10] sm:$0xff] }
   0x8   :  { %77 = vmatprep.subr.mxu0 %v17_v13  ;;  %148 = vmatprep.subr.mxu1 %v19_v14  ;;  %v11_v21 = vld [vmem:[%s289_s1] sm:$0xff] }
   0x9   :  { %78 = vmatpush1.msra.mxu0 %v16_v15  ;;  %149 = vmatpush1.msra.mxu1 %v18_v16 }
   0xa   :  { %79 = vmatprep.subr.mxu0 %v13_v17  ;;  %150 = vmatprep.subr.mxu1 %v15_v18 }
   0xb   :  { %80 = vmatpush1.msra.mxu0 %v12_v19  ;;  %151 = vmatpush1.msra.mxu1 %v14_v20 }
   0xc   :  { %201 = vmatmul.mubr.msk.f32.vlgmr.msra.gmra.mxu0 %vm32_vm1, %v11_v21  ;;  %204 = vmatmul.mubr.msk.f32.vlgmr.msra.gmra.mxu1 %vm32_vm1, %v11_v21 }
  0xcc   :  { %v115_v22 = vpop.f32.mrf.mxu0  ;;  %v186_v23 = vpop.f32.mrf.mxu1 }
  0xce   :  { %v117_v24 = vpop.f32.mrf.mxu0  ;;  %v188_v25 = vpop.f32.mrf.mxu1 }
  0xcf   :  { %v191_v26 = vmax.f32 %v115_v22, %v117_v24  ;;  %v192_v27 = vmax.f32 %v186_v23, %v188_v25 }
  0xd1   :  { %v193_v28 = vmax.f32 %v191_v26, %v192_v27 }
  0xd3   :  { %194 = vst [vmem:[%s290_s2] sm:$0xff] %v193_v28 }

</bundles_post_ra>
